<compile_context>
chip_gen: v6e
topology: v6e:2x2x1
jax: 0.10.0
libtpu: 0.0.40
codegen_flags: <defaults>
</compile_context>

<pallas_src>
import functools
import math

import numpy as np
import jax
import jax.numpy as jnp
from jax.experimental import pallas as pl
from jax.experimental.pallas import tpu as pltpu


def _mlp_kernel(x_ref, w1_ref, b1_ref, w2_ref, b2_ref, o_ref, acc_ref, *,
                mxu_dtype):
    k = pl.program_id(2)

    @pl.when(k == 0)
    def _init():
        acc_ref[...] = jnp.zeros_like(acc_ref)

    # h_k = silu(x @ W1[:, k-chunk] + b1[k-chunk])          (tm, tk), f32
    h = jnp.dot(x_ref[...].astype(mxu_dtype), w1_ref[...].astype(mxu_dtype),
                preferred_element_type=jnp.float32)
    h = h + b1_ref[...].astype(jnp.float32)
    # SiLU with tanh-form sigmoid: tanh goes to the EUP slot, no VALU divide.
    h = h * (0.5 * (jnp.tanh(0.5 * h) + 1.0))

    # acc += h_k @ W2[k-chunk, n-block]                      (tm, tn), f32
    acc_ref[...] += jnp.dot(h.astype(mxu_dtype), w2_ref[...].astype(mxu_dtype),
                            preferred_element_type=jnp.float32)

    @pl.when(k == pl.num_programs(2) - 1)
    def _finalize():
        o_ref[...] = (acc_ref[...] + b2_ref[...].astype(jnp.float32)
                      ).astype(o_ref.dtype)


def mlp_embedder(x, w1, b1, w2, b2, *, tm=None, tn=None, tk=None,
                 compute_dtype=None):
    """x: (..., in_dim); w1: (in_dim, hidden); w2: (hidden, hidden).

    Weights are stored (in_features, out_features), i.e. the transpose of
    PyTorch's nn.Linear.weight, so the kernel computes x @ W (+ b).
    For peak MXU throughput pass bf16 weights (or compute_dtype=jnp.bfloat16);
    accumulation is always f32.
    """
    orig_lead = x.shape[:-1]
    in_dim = x.shape[-1]
    hidden = w1.shape[1]
    assert w1.shape == (in_dim, hidden)
    assert w2.shape == (hidden, hidden)

    M = int(np.prod(orig_lead)) if orig_lead else 1
    x2 = x.reshape(M, in_dim)

    # ---- tile sizes -------------------------------------------------------
    granule = 8 if jnp.dtype(x.dtype).itemsize >= 4 else 16  # sublane packing
    if tm is None:
        tm = 256                       # v7x-safe default (64 MiB VMEM per TC)
    tm = min(tm, ((M + granule - 1) // granule) * granule)
    tm = ((tm + granule - 1) // granule) * granule
    grid_m = pl.cdiv(M, tm)            # Pallas masks the partial last row tile

    # K chunk (streamed reduction over `hidden`): must divide hidden so no
    # out-of-bounds garbage chunk ever contributes to the accumulator.
    if tk is None:
        tk = 512
    tk = min(tk, hidden)
    if tk != hidden and (tk % 128 != 0 or hidden % tk != 0):
        tk = hidden
        for cand in (512, 384, 256, 128):
            if cand < hidden and hidden % cand == 0:
                tk = cand
                break
    grid_k = hidden // tk

    # Output-column split: gives v7x's second TensorCore work when there is
    # only one row tile (the common MLPEmbedder case).
    if tn is None:
        if grid_m == 1 and hidden >= 2048 and hidden % 256 == 0:
            tn = hidden // 2
        else:
            tn = hidden
    assert tn == hidden or (tn % 128 == 0 and hidden % tn == 0)
    grid_n = hidden // tn

    grid = (grid_m, grid_n, grid_k)

    b1_2d = b1.reshape(1, hidden)
    b2_2d = b2.reshape(1, hidden)

    mxu_dtype = jnp.dtype(compute_dtype) if compute_dtype is not None \
        else jnp.dtype(w1.dtype)

    x_spec = pl.BlockSpec((tm, in_dim), lambda i, n, k: (i, 0))
    w1_spec = pl.BlockSpec((in_dim, tk), lambda i, n, k: (0, k))
    b1_spec = pl.BlockSpec((1, tk), lambda i, n, k: (0, k))
    w2_spec = pl.BlockSpec((tk, tn), lambda i, n, k: (k, n))
    b2_spec = pl.BlockSpec((1, tn), lambda i, n, k: (0, n))
    out_spec = pl.BlockSpec((tm, tn), lambda i, n, k: (i, n))

    # ---- VMEM budget (double-buffered input/output tiles + f32 scratch) ----
    def _nbytes(shape, dtype):
        return int(np.prod(shape)) * jnp.dtype(dtype).itemsize

    vmem_bytes = (
        2 * _nbytes((tm, in_dim), x.dtype)
        + 2 * _nbytes((in_dim, tk), w1.dtype)
        + 2 * _nbytes((1, tk), b1.dtype)
        + 2 * _nbytes((tk, tn), w2.dtype)
        + 2 * _nbytes((1, tn), b2.dtype)
        + 2 * _nbytes((tm, tn), x.dtype)        # output tiles
        + _nbytes((tm, tn), jnp.float32)        # accumulator scratch
        + _nbytes((tm, tk), jnp.float32)        # live f32 h intermediate
    )
    vmem_limit = int(vmem_bytes * 1.3)
    vmem_limit = max(vmem_limit, 32 * 1024 * 1024)
    vmem_limit = min(vmem_limit, 64 * 1024 * 1024)

    # ---- cost estimate (per-operand itemsize; streamed W2 re-reads) --------
    itemsz = lambda a: jnp.dtype(a.dtype).itemsize
    cost = pl.CostEstimate(
        flops=2 * M * hidden * in_dim * grid_n + 2 * M * hidden * hidden,
        transcendentals=M * hidden * grid_n,      # tanh in SiLU (per n-block)
        bytes_accessed=(
            M * in_dim * itemsz(x)                              # x (once/row tile)
            + grid_m * grid_n * in_dim * hidden * itemsz(w1)    # W1 re-reads
            + grid_m * hidden * hidden * itemsz(w2)             # W2 re-reads
            + grid_m * grid_n * hidden * (itemsz(b1) + itemsz(b2))
            + M * hidden * itemsz(x)                            # output
        ),
    )

    out = pl.pallas_call(
        functools.partial(_mlp_kernel, mxu_dtype=mxu_dtype),
        out_shape=jax.ShapeDtypeStruct((M, hidden), x.dtype),
        grid_spec=pltpu.PrefetchScalarGridSpec(
            num_scalar_prefetch=0,
            grid=grid,
            in_specs=[x_spec, w1_spec, b1_spec, w2_spec, b2_spec],
            out_specs=out_spec,
            scratch_shapes=[pltpu.VMEM((tm, tn), jnp.float32)],
        ),
        compiler_params=pltpu.CompilerParams(
            dimension_semantics=("parallel", "parallel", "arbitrary"),
            vmem_limit_bytes=vmem_limit,
        ),
        cost_estimate=cost,
    )(x2, w1, b1_2d, w2, b2_2d)

    return out.reshape(*orig_lead, hidden)


def _reference(x, w1, b1, w2, b2):
    # Pure-JAX reference of MLPEmbedder.forward.
    h = x @ w1 + b1
    h = h * jax.nn.sigmoid(h)
    return h @ w2 + b2


if __name__ == "__main__":
    key = jax.random.PRNGKey(0)
    ks = jax.random.split(key, 10)

    # ---- small f32 smoke test (tight tolerance) ----------------------------
    B, S, in_dim, hidden = 2, 8, 32, 32
    x = jax.random.normal(ks[0], (B, S, in_dim), dtype=jnp.float32)
    # (in_features, out_features) layout == PyTorch nn.Linear.weight.T
    w1 = jax.random.normal(ks[1], (in_dim, hidden), jnp.float32) / math.sqrt(in_dim)
    b1 = jax.random.normal(ks[2], (hidden,), jnp.float32) * 0.02
    w2 = jax.random.normal(ks[3], (hidden, hidden), jnp.float32) / math.sqrt(hidden)
    b2 = jax.random.normal(ks[4], (hidden,), jnp.float32) * 0.02

    out = jax.block_until_ready(mlp_embedder(x, w1, b1, w2, b2))
    ref = jax.block_until_ready(_reference(x, w1, b1, w2, b2))
    assert out.shape == (B, S, hidden), out.shape
    assert out.dtype == jnp.float32
    np.testing.assert_allclose(np.asarray(out), np.asarray(ref),
                               rtol=2e-5, atol=2e-5)

    # ---- flux-sized bf16 test (in_dim=256, hidden=3072): exercises the
    #      K-streamed reduction, the N-split, partial row tiles and bf16 MXU --
    in_dim2, hidden2, M2 = 256, 3072, 2
    xb = jax.random.normal(ks[5], (M2, in_dim2), jnp.float32).astype(jnp.bfloat16)
    w1b = (jax.random.normal(ks[6], (in_dim2, hidden2), jnp.float32)
           / math.sqrt(in_dim2)).astype(jnp.bfloat16)
    b1b = (jax.random.normal(ks[7], (hidden2,), jnp.float32) * 0.02).astype(jnp.bfloat16)
    w2b = (jax.random.normal(ks[8], (hidden2, hidden2), jnp.float32)
           / math.sqrt(hidden2)).astype(jnp.bfloat16)
    b2b = (jax.random.normal(ks[9], (hidden2,), jnp.float32) * 0.02).astype(jnp.bfloat16)

    outb = jax.block_until_ready(mlp_embedder(xb, w1b, b1b, w2b, b2b))
    refb = jax.block_until_ready(_reference(
        xb.astype(jnp.float32), w1b.astype(jnp.float32), b1b.astype(jnp.float32),
        w2b.astype(jnp.float32), b2b.astype(jnp.float32)))
    assert outb.shape == (M2, hidden2), outb.shape
    assert outb.dtype == jnp.bfloat16
    np.testing.assert_allclose(np.asarray(outb, dtype=np.float32),
                               np.asarray(refb), rtol=3e-2, atol=3e-2)

    print("KERNEL_OK")
</pallas_src>

<mosaic_0001>
module attributes {stable_mosaic.version = 11 : i64} {
  func.func @_mlp_kernel(%arg0: i32, %arg1: i32, %arg2: i32, %arg3: memref<16x32xf32, #tpu.memory_space<vmem>>, %arg4: memref<32x32xf32, #tpu.memory_space<vmem>>, %arg5: memref<1x32xf32, #tpu.memory_space<vmem>>, %arg6: memref<32x32xf32, #tpu.memory_space<vmem>>, %arg7: memref<1x32xf32, #tpu.memory_space<vmem>>, %arg8: memref<16x32xf32, #tpu.memory_space<vmem>>, %arg9: memref<16x32xf32, #tpu.memory_space<vmem>>) attributes {dimension_semantics = [#tpu.dimension_semantics<parallel>, #tpu.dimension_semantics<parallel>, #tpu.dimension_semantics<arbitrary>], iteration_bounds = array<i64: 1, 1, 1>, scalar_prefetch = 0 : i64, scratch_operands = 1 : i64, tpu.core_type = #tpu.core_type<tc>, window_params = [{transform_indices = @transform_0, window_bounds = array<i64: 16, 32>}, {transform_indices = @transform_1, window_bounds = array<i64: 32, 32>}, {transform_indices = @transform_2, window_bounds = array<i64: 1, 32>}, {transform_indices = @transform_3, window_bounds = array<i64: 32, 32>}, {transform_indices = @transform_4, window_bounds = array<i64: 1, 32>}, {transform_indices = @transform_5, window_bounds = array<i64: 16, 32>}]} {
    %c0_i32 = arith.constant 0 : i32
    %0 = arith.cmpi eq, %arg2, %c0_i32 : i32
    %1 = arith.extui %0 : i1 to i32
    %c0_i32_0 = arith.constant 0 : i32
    %2 = arith.cmpi ne, %1, %c0_i32_0 : i32
    scf.if %2 {
      %cst_18 = arith.constant 0.000000e+00 : f32
      %25 = vector.broadcast %cst_18 : f32 to vector<16x32xf32>
      %c0_19 = arith.constant 0 : index
      %c0_20 = arith.constant 0 : index
      %26 = vector.load %arg9[%c0_19, %c0_20] : memref<16x32xf32, #tpu.memory_space<vmem>>, vector<16x32xf32>
      tpu.vector_store %arg9[%c0_19, %c0_20], %25 {strides = array<i32>} : memref<16x32xf32, #tpu.memory_space<vmem>>, vector<16x32xf32>,
    } else {
    }
    %c0 = arith.constant 0 : index
    %c0_1 = arith.constant 0 : index
    %3 = vector.load %arg3[%c0, %c0_1] : memref<16x32xf32, #tpu.memory_space<vmem>>, vector<16x32xf32>
    %c0_2 = arith.constant 0 : index
    %c0_3 = arith.constant 0 : index
    %4 = vector.load %arg4[%c0_2, %c0_3] : memref<32x32xf32, #tpu.memory_space<vmem>>, vector<32x32xf32>
    %cst = arith.constant dense<0.000000e+00> : vector<16x32xf32>
    %5 = tpu.matmul %3, %4, %cst {dimension_numbers = #tpu.dot_dimension_numbers<[1], [0], [0], [1], [0, 0, 1, 1], [], []>} : vector<16x32xf32>, vector<32x32xf32>, vector<16x32xf32> -> vector<16x32xf32>
    %c0_4 = arith.constant 0 : index
    %c0_5 = arith.constant 0 : index
    %6 = vector.load %arg5[%c0_4, %c0_5] : memref<1x32xf32, #tpu.memory_space<vmem>>, vector<1x32xf32>
    %7 = vector.broadcast %6 : vector<1x32xf32> to vector<16x32xf32>
    %8 = arith.addf %5, %7 : vector<16x32xf32>
    %cst_6 = arith.constant 5.000000e-01 : f32
    %9 = vector.broadcast %cst_6 : f32 to vector<16x32xf32>
    %10 = arith.mulf %9, %8 : vector<16x32xf32>
    %11 = math.tanh %10 : vector<16x32xf32>
    %cst_7 = arith.constant 1.000000e+00 : f32
    %12 = vector.broadcast %cst_7 : f32 to vector<16x32xf32>
    %13 = arith.addf %11, %12 : vector<16x32xf32>
    %cst_8 = arith.constant 5.000000e-01 : f32
    %14 = vector.broadcast %cst_8 : f32 to vector<16x32xf32>
    %15 = arith.mulf %14, %13 : vector<16x32xf32>
    %16 = arith.mulf %8, %15 : vector<16x32xf32>
    %c0_9 = arith.constant 0 : index
    %c0_10 = arith.constant 0 : index
    %17 = vector.load %arg9[%c0_9, %c0_10] : memref<16x32xf32, #tpu.memory_space<vmem>>, vector<16x32xf32>
    %c0_11 = arith.constant 0 : index
    %c0_12 = arith.constant 0 : index
    %18 = vector.load %arg6[%c0_11, %c0_12] : memref<32x32xf32, #tpu.memory_space<vmem>>, vector<32x32xf32>
    %cst_13 = arith.constant dense<0.000000e+00> : vector<16x32xf32>
    %19 = tpu.matmul %16, %18, %cst_13 {dimension_numbers = #tpu.dot_dimension_numbers<[1], [0], [0], [1], [0, 0, 1, 1], [], []>} : vector<16x32xf32>, vector<32x32xf32>, vector<16x32xf32> -> vector<16x32xf32>
    %20 = arith.addf %17, %19 : vector<16x32xf32>
    %c0_14 = arith.constant 0 : index
    %c0_15 = arith.constant 0 : index
    %21 = vector.load %arg9[%c0_14, %c0_15] : memref<16x32xf32, #tpu.memory_space<vmem>>, vector<16x32xf32>
    tpu.vector_store %arg9[%c0_14, %c0_15], %20 {strides = array<i32>} : memref<16x32xf32, #tpu.memory_space<vmem>>, vector<16x32xf32>,
    %c0_i32_16 = arith.constant 0 : i32
    %22 = arith.cmpi eq, %arg2, %c0_i32_16 : i32
    %23 = arith.extui %22 : i1 to i32
    %c0_i32_17 = arith.constant 0 : i32
    %24 = arith.cmpi ne, %23, %c0_i32_17 : i32
    scf.if %24 {
      %c0_18 = arith.constant 0 : index
      %c0_19 = arith.constant 0 : index
      %25 = vector.load %arg9[%c0_18, %c0_19] : memref<16x32xf32, #tpu.memory_space<vmem>>, vector<16x32xf32>
      %c0_20 = arith.constant 0 : index
      %c0_21 = arith.constant 0 : index
      %26 = vector.load %arg7[%c0_20, %c0_21] : memref<1x32xf32, #tpu.memory_space<vmem>>, vector<1x32xf32>
      %27 = vector.broadcast %26 : vector<1x32xf32> to vector<16x32xf32>
      %28 = arith.addf %25, %27 : vector<16x32xf32>
      %c0_22 = arith.constant 0 : index
      %c0_23 = arith.constant 0 : index
      %29 = vector.load %arg8[%c0_22, %c0_23] : memref<16x32xf32, #tpu.memory_space<vmem>>, vector<16x32xf32>
      tpu.vector_store %arg8[%c0_22, %c0_23], %28 {strides = array<i32>} : memref<16x32xf32, #tpu.memory_space<vmem>>, vector<16x32xf32>,
    } else {
    }
    return
  }
  func.func @transform_0(%arg0: i32, %arg1: i32, %arg2: i32) -> (i32, i32) {
    %c0_i32 = arith.constant 0 : i32
    %c0_i32_0 = arith.constant 0 : i32
    return %arg0, %c0_i32 : i32, i32
  }
  func.func @transform_1(%arg0: i32, %arg1: i32, %arg2: i32) -> (i32, i32) {
    %c0_i32 = arith.constant 0 : i32
    %c0_i32_0 = arith.constant 0 : i32
    return %c0_i32, %arg2 : i32, i32
  }
  func.func @transform_2(%arg0: i32, %arg1: i32, %arg2: i32) -> (i32, i32) {
    %c0_i32 = arith.constant 0 : i32
    %c0_i32_0 = arith.constant 0 : i32
    return %c0_i32, %arg2 : i32, i32
  }
  func.func @transform_3(%arg0: i32, %arg1: i32, %arg2: i32) -> (i32, i32) {
    %c0_i32 = arith.constant 0 : i32
    return %arg2, %arg1 : i32, i32
  }
  func.func @transform_4(%arg0: i32, %arg1: i32, %arg2: i32) -> (i32, i32) {
    %c0_i32 = arith.constant 0 : i32
    %c0_i32_0 = arith.constant 0 : i32
    return %c0_i32, %arg1 : i32, i32
  }
  func.func @transform_5(%arg0: i32, %arg1: i32, %arg2: i32) -> (i32, i32) {
    %c0_i32 = arith.constant 0 : i32
    return %arg0, %arg1 : i32, i32
  }
}

</mosaic_0001>

<bundles_post_ra>
// kernel: tpu_custom_call.1
= control target key start
LH: loop header
LB: loop body
LE: loop exit
PB: predicated region body
PF: predicated region fallthrough
CT: control target
= control target key end

     0   :  { %10 = vsyncpa [#allocation4], 0  ;;  %s513_s0 = inlined_call_operand.hbm [shape: f32[16,32], index: 0, kind: input, shape index: {}]   ;;  %s514_s1 = inlined_call_operand.hbm [shape: f32[32,32], index: 1, kind: input, shape index: {}]   ;;  %s515_s2 = inlined_call_operand.vmem [shape: f32[1,32], index: 2, kind: input, shape index: {}]   ;;  %s516_s3 = inlined_call_operand.hbm [shape: f32[32,32], index: 3, kind: input, shape index: {}]   ;;  %s517_s4 = inlined_call_operand.vmem [shape: f32[1,32], index: 4, kind: input, shape index: {}]   ;;  %s518_s5 = inlined_call_operand.hbm [shape: f32[16,32], index: 5, kind: output, shape index: {}]  }
   0x1   :  { %11 = vsyncpa [#allocation7], 0 }
   0x2   :  { %12 = vsyncpa [#allocation5], 0  ;;  %s436_s18 = smov [#allocation6]   ;;  %s437_s20 = smov [#allocation3]  }
   0x3   :  { %s30_s19 = sshll.u32 %s436_s18, 4  ;;  %s18_s21 = sshll.u32 %s437_s20, 4  ;;  %s31_s19 = int_to_ptr.vmem [resolvable:$true] %s30_s19  ;;  %s19_s21 = int_to_ptr.vmem [resolvable:$true] %s18_s21 }
   0x4   :  { %s358_s22 = scalar_lea.vmem %s31_s19, 512  ;;  %p363_p1 = scmp.lt.s32.totalorder %s31_s19, %s31_s19 }
   0x5   :  { %p359_p0 = scmp.ne.s32.totalorder %s31_s19, %s358_s22  ;;  %p364_p2 = scmp.lt.s32.totalorder %s358_s22, %s358_s22 }
   0x7   :  { %p365_p3 = por %p364_p2, %p363_p1 }
   0x9   :  { %p366_p4 = pnand %p365_p3, %p359_p0 }
   0xb   :  { %369 = shalt.err (!%p366_p4)
}
   0xc   :  { %s438_s23 = smov 128   ;;  %s439_s24 = smov 8  }
   0xd   :  { %36 = dma.hbm_to_vmem [thread:$0]  %s514_s1, 512, %s31_s19, [#allocation7], %s438_s23, %s438_s23, %s439_s24  }
   0xe   :  { %s378_s27 = scalar_lea.vmem %s19_s21, 256  ;;  %p383_p6 = scmp.lt.s32.totalorder %s19_s21, %s19_s21 }
   0xf   :  { %p379_p5 = scmp.ne.s32.totalorder %s19_s21, %s378_s27  ;;  %p384_p7 = scmp.lt.s32.totalorder %s378_s27, %s378_s27 }
  0x11   :  { %p385_p8 = por %p384_p7, %p383_p6 }
  0x13   :  { %p386_p9 = pnand %p385_p8, %p379_p5 }
  0x15   :  { %389 = shalt.err (!%p386_p9)
}
  0x16   :  { %24 = dma.hbm_to_vmem [thread:$0]  %s513_s0, 256, %s19_s21, [#allocation4], %s438_s23, %s438_s23, %s439_s24  }
  0x17   :  { %s440_s30 = smov [#allocation8]  }
  0x18   :  { %s44_s6 = sshll.u32 %s440_s30, 4  ;;  %s45_s6 = int_to_ptr.vmem [resolvable:$true] %s44_s6 }
  0x19   :  { %s398_s7 = scalar_lea.vmem %s45_s6, 512  ;;  %p403_p11 = scmp.lt.s32.totalorder %s45_s6, %s45_s6 }
  0x1a   :  { %p399_p10 = scmp.ne.s32.totalorder %s45_s6, %s398_s7  ;;  %p404_p12 = scmp.lt.s32.totalorder %s398_s7, %s398_s7 }
  0x1c   :  { %p405_p13 = por %p404_p12, %p403_p11 }
  0x1e   :  { %p406_p0 = pnand %p405_p13, %p399_p10 }
  0x20   :  { %409 = shalt.err (!%p406_p0)
}
  0x21   :  { %50 = dma.hbm_to_vmem [thread:$0]  %s516_s3, 512, %s45_s6, [#allocation7], %s438_s23, %s438_s23, %s439_s24  }
  0x22   :  { %430 = dma.done.wait [#allocation4], 256  }
  0x23   :  { %431 = vsyncadd [#allocation4], 4294967040 }
  0x24   :  { %432 = dma.done.wait [#allocation7], 1024  }
  0x25   :  { %433 = vsyncadd [#allocation7], 4294966272  ;;  %vm66_vm0 = vcmask 261120   ;;  %v74_v0 = vld [vmem:[#allocation6 + $0x18] sm:$0xff]  ;;  %v73_v1 = vld [vmem:[#allocation6 + $0x10] sm:$0xff]  ;;  %v441_v10 = vmov 0.0  }
  0x26   :  { %317 = vmatprep.subr.mxu0 %v74_v0  ;;  %v69_v2 = vld [vmem:[#allocation3] sm:$0xff]  ;;  %v72_v3 = vld [vmem:[#allocation6 + $0x8] sm:$0xff]  ;;  %v71_v4 = vld [vmem:[#allocation6] sm:$0xff]  ;;  %68 = vst.msk [vmem:[#allocation2 + $0x8] sm:$0xff] %vm66_vm0, %v441_v10  ;;  %s442_s10 = smov [#allocation9]  }
  0x27   :  { %318 = vmatpush3.msra.mxu0 %v74_v0  ;;  %325 = vmatprep.mubr.msk.f32.mxu0 %vm66_vm0, %v69_v2  ;;  %v70_v5 = vld [vmem:[#allocation3 + $0x8] sm:$0xff]  ;;  %v178_v7 = vld [vmem:[#allocation8 + $0x10] sm:$0xff]  ;;  %v177_v8 = vld [vmem:[#allocation8 + $0x8] sm:$0xff]  ;;  %67 = vst.msk [vmem:[#allocation2] sm:$0xff] %vm66_vm0, %v441_v10  ;;  %s286_s11 = sshll.u32 %s442_s10, 4  ;;  %s287_s11 = int_to_ptr.vmem [resolvable:$true] %s286_s11 }
  0x28   :  { %319 = vmatprep.subr.mxu0 %v73_v1  ;;  %v179_v6 = vld [vmem:[#allocation8 + $0x18] sm:$0xff]  ;;  %v176_v9 = vld [vmem:[#allocation8] sm:$0xff]  ;;  %s410_s12 = scalar_lea.vmem %s287_s11, 256  ;;  %p415_p2 = scmp.lt.s32.totalorder %s287_s11, %s287_s11 }
  0x29   :  { %320 = vmatpush3.msra.mxu0 %v73_v1  ;;  %328 = vmatprep.subr.mxu1 %v179_v6  ;;  %v299_v11 = vld [vmem:[%s515_s2] ss:$0 sm:$0xff]  ;;  %p411_p1 = scmp.ne.s32.totalorder %s287_s11, %s410_s12  ;;  %p416_p3 = scmp.lt.s32.totalorder %s410_s12, %s410_s12 }
  0x2a   :  { %321 = vmatprep.subr.mxu0 %v72_v3  ;;  %329 = vmatpush3.msra.mxu1 %v179_v6  ;;  %v304_v32 = vld [vmem:[%s517_s4] ss:$0 sm:$0xff] }
  0x2b   :  { %322 = vmatpush3.msra.mxu0 %v72_v3  ;;  %330 = vmatprep.subr.mxu1 %v178_v7  ;;  %p417_p4 = por %p416_p3, %p415_p2 }
  0x2c   :  { %323 = vmatprep.subr.mxu0 %v71_v4  ;;  %331 = vmatpush3.msra.mxu1 %v178_v7 }
  0x2d   :  { %324 = vmatpush3.msra.mxu0 %v71_v4  ;;  %332 = vmatprep.subr.mxu1 %v177_v8  ;;  %v175_v26 = vld [vmem:[#allocation2 + $0x8] sm:$0xff]  ;;  %p418_p5 = pnand %p417_p4, %p411_p1 }
  0x2e   :  { %326 = vmatmul.mubr.msk.f32.vlgmr.msra.gmra.mxu0 %vm66_vm0, %v70_v5  ;;  %333 = vmatpush3.msra.mxu1 %v177_v8  ;;  %v174_v28 = vld [vmem:[#allocation2] sm:$0xff] }
  0x2f   :  { %334 = vmatprep.subr.mxu1 %v176_v9 }
  0x30   :  { %335 = vmatpush3.msra.mxu1 %v176_v9 }
  0xee   :  { %v327_v12 = vpop.f32.mrf.mxu0 }
  0xef   :  { %v161_v13 = vadd.f32 %v327_v12, %v299_v11 }
  0xf0   :  { %v155_v14 = vpop.f32.mrf.mxu0 }
  0xf1   :  { %v165_v15 = vmul.f32 0.5, %v161_v13  ;;  %v156_v16 = vadd.f32 %v299_v11, %v155_v14 }
  0xf3   :  { %346 = vtanh.f32 %v165_v15  ;;  %v164_v17 = vmul.f32 0.5, %v156_v16 }
  0xf5   :  { %348 = vtanh.f32 %v164_v17 }
 0x100   :  { %v347_v18 = vpop.eup %346 }
 0x101   :  { %v169_v19 = vadd.f32 1.0, %v347_v18 }
 0x102   :  { %v349_v20 = vpop.eup %348 }
 0x103   :  { %v168_v21 = vadd.f32 1.0, %v349_v20  ;;  %v171_v22 = vmul.f32 0.5, %v169_v19 }
 0x105   :  { %v170_v23 = vmul.f32 0.5, %v168_v21  ;;  %v173_v25 = vmul.f32 %v171_v22, %v161_v13 }
 0x107   :  { %v172_v24 = vmul.f32 %v170_v23, %v156_v16 }
 0x109   :  { %336 = vmatprep.mubr.msk.f32.mxu1 %vm66_vm0, %v172_v24 }
 0x10a   :  { %337 = vmatmul.mubr.msk.f32.vlgmr.msra.gmra.mxu1 %vm66_vm0, %v173_v25 }
 0x1ca   :  { %v338_v27 = vpop.f32.mrf.mxu1 }
 0x1cb   :  { %v262_v29 = vadd.f32 %v338_v27, %v175_v26 }
 0x1cc   :  { %v252_v30 = vpop.f32.mrf.mxu1 }
 0x1cd   :  { %264 = vst.msk [vmem:[#allocation2 + $0x8] sm:$0xff] %vm66_vm0, %v262_v29  ;;  %v261_v31 = vadd.f32 %v252_v30, %v174_v28 }
 0x1cf   :  { %263 = vst.msk [vmem:[#allocation2] sm:$0xff] %vm66_vm0, %v261_v31 }
 0x1d4   :  { %v269_v33 = vld [vmem:[#allocation2 + $0x8] sm:$0xff] }
 0x1d5   :  { %v278_v34 = vadd.f32 %v304_v32, %v269_v33 }
 0x1d6   :  { %v268_v35 = vld [vmem:[#allocation2] sm:$0xff] }
 0x1d7   :  { %v277_v36 = vadd.f32 %v304_v32, %v268_v35  ;;  %280 = vst.msk [vmem:[#allocation9 + $0x8] sm:$0xff] %vm66_vm0, %v278_v34 }
 0x1d9   :  { %279 = vst.msk [vmem:[#allocation9] sm:$0xff] %vm66_vm0, %v277_v36 }
 0x1da   :  { %421 = shalt.err (!%p418_p5)
}
 0x1db   :  { %292 = dma.vmem_to_hbm [thread:$0]  %s287_s11, 256, %s518_s5, [#allocation5], %s438_s23, %s438_s23, %s439_s24  }
 0x1dc   :  { %434 = dma.done.wait [#allocation5], 256  }
 0x1dd   :  { %435 = vsyncadd [#allocation5], 4294967040 }
 0x1de   :  { %296 = vsyncpa [#allocation4], 1 }
 0x1df   :  { %297 = vsyncpa [#allocation7], 1 }
 0x1e0   :  { %298 = vsyncpa [#allocation5], 1 }

</bundles_post_ra>
